<compile_context>
chip_gen: v7x
topology: tpu7x:2x2x1
jax: 0.10.0
libtpu: 0.0.40
codegen_flags: <defaults>
</compile_context>

<pallas_src>
import functools

import jax
import jax.numpy as jnp
from jax.experimental import pallas as pl
from jax.experimental.pallas import tpu as pltpu


def _round_up(x, m):
    return (x + m - 1) // m * m


def _fused_gcn_kernel(*refs, n_layers, feat_pads):
    """Fused GCN stack, all layers in one grid-less invocation.

    refs = (a_ref, x_ref, w_0..w_{L-1}, b_0..b_{L-1}, o_ref)
      a_ref : [Np, Np]        bf16 normalized adjacency, VMEM-resident
      x_ref : [Np, Fp_in0]    f32 padded node features
      w_l   : [Fin_p, Fout_p] bf16 padded weight (per-layer widths)
      b_l   : [1, Fout_p]     f32 padded bias
      o_ref : [Np, sum(Fout_p)] f32 lane-dense slab [h1 | h2 | ... | hL]
    """
    a_ref = refs[0]
    x_ref = refs[1]
    w_refs = refs[2:2 + n_layers]
    b_refs = refs[2 + n_layers:2 + 2 * n_layers]
    o_ref = refs[2 + 2 * n_layers]

    h = x_ref[...]                       # running features, kept in f32
    col = 0
    for l in range(n_layers):            # static unroll over layers
        fin_p, fout_p = feat_pads[l]
        w = w_refs[l][...]               # bf16 [fin_p, fout_p]
        b = b_refs[l][...]               # f32  [1, fout_p]
        if fin_p <= fout_p:
            # Narrow(er) input: aggregate first -> (A @ H) @ W
            ah = jnp.dot(a_ref[...], h.astype(jnp.bfloat16),
                         preferred_element_type=jnp.float32)
            h = jnp.dot(ah.astype(jnp.bfloat16), w,
                        preferred_element_type=jnp.float32) + b
        else:
            # Narrow(er) output: project first -> A @ (H @ W)
            hw = jnp.dot(h.astype(jnp.bfloat16), w,
                         preferred_element_type=jnp.float32)
            h = jnp.dot(a_ref[...], hw.astype(jnp.bfloat16),
                        preferred_element_type=jnp.float32) + b
        # 128-aligned column offset: unmasked full-lane stores.
        o_ref[:, col:col + fout_p] = h
        col += fout_p


def build_normalized_adjacency(edge_index, num_nodes, dtype=jnp.float32):
    """Dense A_hat = D^{-1/2}(A+I)D^{-1/2} from a [2, E] edge_index.

    Matches PyG gcn_norm(add_self_loops=True).  Plain-JAX glue, not hot path.
    """
    src, dst = edge_index[0], edge_index[1]
    adj = jnp.zeros((num_nodes, num_nodes), jnp.float32)
    # row = destination (aggregation target), col = source (message sender)
    adj = adj.at[dst, src].add(1.0)
    diag = jnp.diagonal(adj)
    adj = adj + jnp.diag(jnp.where(diag > 0.0, 0.0, 1.0))  # remaining self-loops
    deg = adj.sum(axis=1)
    deg_inv_sqrt = jnp.where(deg > 0.0, jax.lax.rsqrt(deg), 0.0)
    a_hat = deg_inv_sqrt[:, None] * adj * deg_inv_sqrt[None, :]
    return a_hat.astype(dtype)


def gcngnn_forward(x, edge_index, params, cat=True, adj_dtype=jnp.bfloat16):
    """Forward pass of GCNGNN: fused stack of GCNConv layers, concat all xs."""
    n, in_ch = x.shape
    n_layers = len(params)

    # Per-layer real and 128-padded feature widths.
    feat_dims, feat_pads = [], []
    f_in = in_ch
    for (w, _) in params:
        f_out = w.shape[1]
        feat_dims.append((f_in, f_out))
        feat_pads.append((_round_up(f_in, 128), _round_up(f_out, 128)))
        f_in = f_out

    # N padded to 128: lane-dense A columns, clean bf16 (16,128) tiles.
    n_pad = _round_up(n, 128)
    fin_p0 = feat_pads[0][0]
    out_cols = [0]
    for (_, fp_out) in feat_pads:
        out_cols.append(out_cols[-1] + fp_out)
    out_w = out_cols[-1]

    # --- padded, VMEM-friendly operands --------------------------------------
    a_hat = build_normalized_adjacency(edge_index, n, dtype=adj_dtype)
    a_pad = jnp.zeros((n_pad, n_pad), adj_dtype).at[:n, :n].set(a_hat)
    x_pad = jnp.zeros((n_pad, fin_p0), jnp.float32).at[:n, :in_ch].set(x)

    w_pads, b_pads = [], []
    for l, (w, b) in enumerate(params):
        f_in_l, f_out_l = feat_dims[l]
        fin_p, fout_p = feat_pads[l]
        # Padded columns/rows stay exactly zero (invariant for correctness).
        w_pads.append(jnp.zeros((fin_p, fout_p), jnp.bfloat16)
                      .at[:f_in_l, :f_out_l].set(w.astype(jnp.bfloat16)))
        b_pads.append(jnp.zeros((1, fout_p), jnp.float32)
                      .at[0, :f_out_l].set(b.reshape(-1)))

    # --- cost estimate & tightened VMEM budget --------------------------------
    a_bytes = n_pad * n_pad * jnp.dtype(adj_dtype).itemsize
    x_bytes = n_pad * fin_p0 * 4
    w_bytes = sum(fi * fo * 2 for (fi, fo) in feat_pads)
    b_bytes = sum(8 * fo * 4 for (_, fo) in feat_pads)   # [1,F] pads to 8 sublanes
    out_bytes = n_pad * out_w * 4
    bytes_accessed = a_bytes + x_bytes + w_bytes + b_bytes + out_bytes

    flops = 0
    for (fi, fo) in feat_pads:
        agg_w = fi if fi <= fo else fo                    # width fed to A matmul
        flops += 2 * n_pad * n_pad * agg_w + 2 * n_pad * fi * fo

    max_fp = max(max(p) for p in feat_pads)
    # Temps: ah/hw (f32) + its bf16 copy + running h (f32) + its bf16 copy.
    temp_bytes = n_pad * max_fp * (4 + 2 + 4 + 2)
    vmem_needed = bytes_accessed + temp_bytes
    try:
        vmem_cap = pltpu.get_tpu_info().vmem_capacity_bytes
    except Exception:
        vmem_cap = 64 * 1024 * 1024                       # conservative (v7x)
    vmem_limit = int(min(max(vmem_needed + (4 << 20), 8 << 20),
                         int(0.9 * vmem_cap)))

    kernel = functools.partial(
        _fused_gcn_kernel, n_layers=n_layers, feat_pads=tuple(feat_pads))

    n_in = 2 + 2 * n_layers
    out = pl.pallas_call(
        kernel,
        out_shape=jax.ShapeDtypeStruct((n_pad, out_w), jnp.float32),
        # No grid: single invocation, whole arrays resident in VMEM,
        # single-buffered (no double-buffering of the large A_hat).
        in_specs=[pl.BlockSpec(memory_space=pltpu.MemorySpace.VMEM)] * n_in,
        out_specs=pl.BlockSpec(memory_space=pltpu.MemorySpace.VMEM),
        compiler_params=pltpu.CompilerParams(vmem_limit_bytes=vmem_limit),
        cost_estimate=pl.CostEstimate(
            flops=flops, transcendentals=0, bytes_accessed=bytes_accessed),
    )(a_pad, x_pad, *w_pads, *b_pads)

    # Slice real widths out of the lane-dense slab; x comes from the wrapper.
    slices = [x]
    for l, (_, f_out_l) in enumerate(feat_dims):
        c = out_cols[l]
        slices.append(out[:n, c:c + f_out_l])
    return jnp.concatenate(slices, axis=-1) if cat else slices[-1]


def gcngnn_reference(x, edge_index, params, cat=True):
    """Pure-JAX f32 reference (same math, no Pallas) for tolerance checks."""
    a_hat = build_normalized_adjacency(edge_index, x.shape[0], dtype=jnp.float32)
    xs = [x]
    for (w, b) in params:
        xs.append(a_hat @ (xs[-1] @ w) + b)
    return jnp.concatenate(xs, axis=-1) if cat else xs[-1]


def init_params(key, in_channels, out_channels, n_layers):
    """Deterministic init matching GCNConv defaults: glorot weight, zero bias."""
    params = []
    f_in = in_channels
    keys = jax.random.split(key, n_layers)
    for l in range(n_layers):
        limit = (6.0 / (f_in + out_channels)) ** 0.5
        w = jax.random.uniform(
            keys[l], (f_in, out_channels), jnp.float32, -limit, limit)
        b = jnp.zeros((1, out_channels), jnp.float32)
        params.append((w, b))
        f_in = out_channels
    return params


if __name__ == "__main__":
    key = jax.random.PRNGKey(0)
    k_x, k_w = jax.random.split(key)

    N = 16            # number of nodes
    in_channels = 8
    out_channels = 16
    n_layers = 3

    # Node features [N, F_in]
    x = jax.random.normal(k_x, (N, in_channels), jnp.float32)

    # Simple undirected ring graph: edge_index is [2, E] (src; dst)
    src = jnp.arange(N, dtype=jnp.int32)
    dst = (src + 1) % N
    edge_index = jnp.stack(
        [jnp.concatenate([src, dst]), jnp.concatenate([dst, src])], axis=0)

    params = init_params(k_w, in_channels, out_channels, n_layers)

    out = gcngnn_forward(x, edge_index, params, cat=True)
    out = jax.block_until_ready(out)

    expected_feat = in_channels + n_layers * out_channels  # 8 + 3*16 = 56
    assert out.shape == (N, expected_feat), out.shape
    assert bool(jnp.all(jnp.isfinite(out)))

    # Tolerance-asserted reference check (bf16 A/W/H casts -> few % rel err).
    ref = gcngnn_reference(x, edge_index, params, cat=True)
    assert bool(jnp.allclose(out, ref, rtol=5e-2, atol=5e-2)), (
        float(jnp.max(jnp.abs(out - ref))))

    print("KERNEL_OK")
</pallas_src>

<mosaic_0001>
module attributes {stable_mosaic.version = 11 : i64} {
  func.func @_fused_gcn_kernel(%arg0: memref<128x128xbf16, #tpu.memory_space<vmem>>, %arg1: memref<128x128xf32, #tpu.memory_space<vmem>>, %arg2: memref<128x128xbf16, #tpu.memory_space<vmem>>, %arg3: memref<128x128xbf16, #tpu.memory_space<vmem>>, %arg4: memref<128x128xbf16, #tpu.memory_space<vmem>>, %arg5: memref<1x128xf32, #tpu.memory_space<vmem>>, %arg6: memref<1x128xf32, #tpu.memory_space<vmem>>, %arg7: memref<1x128xf32, #tpu.memory_space<vmem>>, %arg8: memref<128x384xf32, #tpu.memory_space<vmem>>) attributes {dimension_semantics = [], scalar_prefetch = 0 : i64, scratch_operands = 0 : i64, tpu.core_type = #tpu.core_type<tc>} {
    %c0 = arith.constant 0 : index
    %c0_0 = arith.constant 0 : index
    %0 = vector.load %arg1[%c0, %c0_0] : memref<128x128xf32, #tpu.memory_space<vmem>>, vector<128x128xf32>
    %c0_1 = arith.constant 0 : index
    %c0_2 = arith.constant 0 : index
    %1 = vector.load %arg2[%c0_1, %c0_2] : memref<128x128xbf16, #tpu.memory_space<vmem>>, vector<128x128xbf16>
    %c0_3 = arith.constant 0 : index
    %c0_4 = arith.constant 0 : index
    %2 = vector.load %arg5[%c0_3, %c0_4] : memref<1x128xf32, #tpu.memory_space<vmem>>, vector<1x128xf32>
    %c0_5 = arith.constant 0 : index
    %c0_6 = arith.constant 0 : index
    %3 = vector.load %arg0[%c0_5, %c0_6] : memref<128x128xbf16, #tpu.memory_space<vmem>>, vector<128x128xbf16>
    %4 = arith.truncf %0 : vector<128x128xf32> to vector<128x128xbf16>
    %cst = arith.constant dense<0.000000e+00> : vector<128x128xf32>
    %5 = tpu.matmul %3, %4, %cst {dimension_numbers = #tpu.dot_dimension_numbers<[1], [0], [0], [1], [0, 0, 1, 1], [], []>} : vector<128x128xbf16>, vector<128x128xbf16>, vector<128x128xf32> -> vector<128x128xf32>
    %6 = arith.truncf %5 : vector<128x128xf32> to vector<128x128xbf16>
    %cst_7 = arith.constant dense<0.000000e+00> : vector<128x128xf32>
    %7 = tpu.matmul %6, %1, %cst_7 {dimension_numbers = #tpu.dot_dimension_numbers<[1], [0], [0], [1], [0, 0, 1, 1], [], []>} : vector<128x128xbf16>, vector<128x128xbf16>, vector<128x128xf32> -> vector<128x128xf32>
    %8 = vector.broadcast %2 : vector<1x128xf32> to vector<128x128xf32>
    %9 = arith.addf %7, %8 : vector<128x128xf32>
    %c0_8 = arith.constant 0 : index
    %c0_9 = arith.constant 0 : index
    %10 = vector.load %arg8[%c0_8, %c0_9] : memref<128x384xf32, #tpu.memory_space<vmem>>, vector<128x128xf32>
    tpu.vector_store %arg8[%c0_8, %c0_9], %9 {strides = array<i32>} : memref<128x384xf32, #tpu.memory_space<vmem>>, vector<128x128xf32>,
    %c0_10 = arith.constant 0 : index
    %c0_11 = arith.constant 0 : index
    %11 = vector.load %arg3[%c0_10, %c0_11] : memref<128x128xbf16, #tpu.memory_space<vmem>>, vector<128x128xbf16>
    %c0_12 = arith.constant 0 : index
    %c0_13 = arith.constant 0 : index
    %12 = vector.load %arg6[%c0_12, %c0_13] : memref<1x128xf32, #tpu.memory_space<vmem>>, vector<1x128xf32>
    %c0_14 = arith.constant 0 : index
    %c0_15 = arith.constant 0 : index
    %13 = vector.load %arg0[%c0_14, %c0_15] : memref<128x128xbf16, #tpu.memory_space<vmem>>, vector<128x128xbf16>
    %14 = arith.truncf %9 : vector<128x128xf32> to vector<128x128xbf16>
    %cst_16 = arith.constant dense<0.000000e+00> : vector<128x128xf32>
    %15 = tpu.matmul %13, %14, %cst_16 {dimension_numbers = #tpu.dot_dimension_numbers<[1], [0], [0], [1], [0, 0, 1, 1], [], []>} : vector<128x128xbf16>, vector<128x128xbf16>, vector<128x128xf32> -> vector<128x128xf32>
    %16 = arith.truncf %15 : vector<128x128xf32> to vector<128x128xbf16>
    %cst_17 = arith.constant dense<0.000000e+00> : vector<128x128xf32>
    %17 = tpu.matmul %16, %11, %cst_17 {dimension_numbers = #tpu.dot_dimension_numbers<[1], [0], [0], [1], [0, 0, 1, 1], [], []>} : vector<128x128xbf16>, vector<128x128xbf16>, vector<128x128xf32> -> vector<128x128xf32>
    %18 = vector.broadcast %12 : vector<1x128xf32> to vector<128x128xf32>
    %19 = arith.addf %17, %18 : vector<128x128xf32>
    %c0_18 = arith.constant 0 : index
    %c128 = arith.constant 128 : index
    %20 = vector.load %arg8[%c0_18, %c128] : memref<128x384xf32, #tpu.memory_space<vmem>>, vector<128x128xf32>
    tpu.vector_store %arg8[%c0_18, %c128], %19 {strides = array<i32>} : memref<128x384xf32, #tpu.memory_space<vmem>>, vector<128x128xf32>,
    %c0_19 = arith.constant 0 : index
    %c0_20 = arith.constant 0 : index
    %21 = vector.load %arg4[%c0_19, %c0_20] : memref<128x128xbf16, #tpu.memory_space<vmem>>, vector<128x128xbf16>
    %c0_21 = arith.constant 0 : index
    %c0_22 = arith.constant 0 : index
    %22 = vector.load %arg7[%c0_21, %c0_22] : memref<1x128xf32, #tpu.memory_space<vmem>>, vector<1x128xf32>
    %c0_23 = arith.constant 0 : index
    %c0_24 = arith.constant 0 : index
    %23 = vector.load %arg0[%c0_23, %c0_24] : memref<128x128xbf16, #tpu.memory_space<vmem>>, vector<128x128xbf16>
    %24 = arith.truncf %19 : vector<128x128xf32> to vector<128x128xbf16>
    %cst_25 = arith.constant dense<0.000000e+00> : vector<128x128xf32>
    %25 = tpu.matmul %23, %24, %cst_25 {dimension_numbers = #tpu.dot_dimension_numbers<[1], [0], [0], [1], [0, 0, 1, 1], [], []>} : vector<128x128xbf16>, vector<128x128xbf16>, vector<128x128xf32> -> vector<128x128xf32>
    %26 = arith.truncf %25 : vector<128x128xf32> to vector<128x128xbf16>
    %cst_26 = arith.constant dense<0.000000e+00> : vector<128x128xf32>
    %27 = tpu.matmul %26, %21, %cst_26 {dimension_numbers = #tpu.dot_dimension_numbers<[1], [0], [0], [1], [0, 0, 1, 1], [], []>} : vector<128x128xbf16>, vector<128x128xbf16>, vector<128x128xf32> -> vector<128x128xf32>
    %28 = vector.broadcast %22 : vector<1x128xf32> to vector<128x128xf32>
    %29 = arith.addf %27, %28 : vector<128x128xf32>
    %c0_27 = arith.constant 0 : index
    %c256 = arith.constant 256 : index
    %30 = vector.load %arg8[%c0_27, %c256] : memref<128x384xf32, #tpu.memory_space<vmem>>, vector<128x128xf32>
    tpu.vector_store %arg8[%c0_27, %c256], %29 {strides = array<i32>} : memref<128x384xf32, #tpu.memory_space<vmem>>, vector<128x128xf32>,
    return
  }
}

</mosaic_0001>

<bundles_post_ra>
// kernel: tpu_custom_call.1
= control target key start
LH: loop header
LB: loop body
LE: loop exit
PB: predicated region body
PF: predicated region fallthrough
CT: control target
= control target key end

     0   :  { %13 = vsyncpa [#allocation3], 0  ;;  %s1942_s0 = inlined_call_operand.hbm [shape: bf16[128,128], index: 0, kind: input, shape index: {}]   ;;  %s1943_s1 = inlined_call_operand.hbm [shape: f32[128,128], index: 1, kind: input, shape index: {}]   ;;  %s1944_s2 = inlined_call_operand.hbm [shape: bf16[128,128], index: 2, kind: input, shape index: {}]   ;;  %s1945_s3 = inlined_call_operand.hbm [shape: bf16[128,128], index: 3, kind: input, shape index: {}]   ;;  %s1946_s4 = inlined_call_operand.hbm [shape: bf16[128,128], index: 4, kind: input, shape index: {}]   ;;  %s1947_s5 = inlined_call_operand.vmem [shape: f32[1,128], index: 5, kind: input, shape index: {}]   ;;  %s1948_s6 = inlined_call_operand.vmem [shape: f32[1,128], index: 6, kind: input, shape index: {}]   ;;  %s1949_s7 = inlined_call_operand.vmem [shape: f32[1,128], index: 7, kind: input, shape index: {}]   ;;  %s1950_s8 = inlined_call_operand.hbm [shape: f32[128,384], index: 8, kind: output, shape index: {}]  }
   0x1   :  { %14 = vsyncpa [#allocation6], 0 }
   0x2   :  { %15 = vsyncpa [#allocation9], 0 }
   0x3   :  { %16 = vsyncpa [#allocation4], 0  ;;  %s1756_s27 = smov [#allocation5]   ;;  %s1616_s9 = scalar_lea.hbm %s1943_s1, 2048 }
   0x4   :  { %s34_s28 = sshll.u32 %s1756_s27, 4  ;;  %p1617_p0 = scmp.ne.s32.totalorder %s1943_s1, %s1616_s9  ;;  %s35_s28 = int_to_ptr.vmem [resolvable:$true] %s34_s28 }
   0x5   :  { %p1620_p1 = scmp.lt.u32.totalorder %s1616_s9, %s1943_s1 }
   0x7   :  { %p1622_p2 = pnand %p1620_p1, %p1617_p0 }
   0x9   :  { %1625 = shalt.err (!%p1622_p2)
}
   0xa   :  { %s1626_s14 = scalar_lea.vmem %s35_s28, 2048  ;;  %p1631_p4 = scmp.lt.s32.totalorder %s35_s28, %s35_s28 }
   0xb   :  { %p1627_p3 = scmp.ne.s32.totalorder %s35_s28, %s1626_s14  ;;  %p1632_p5 = scmp.lt.s32.totalorder %s1626_s14, %s1626_s14 }
   0xd   :  { %p1633_p6 = por %p1632_p5, %p1631_p4 }
   0xf   :  { %p1634_p7 = pnand %p1633_p6, %p1627_p3 }
  0x11   :  { %1637 = shalt.err (!%p1634_p7)
}
  0x12   :  { %s1757_s15 = smov 128   ;;  %s1758_s16 = smov 8  }
  0x13   :  { %40 = dma.hbm_to_vmem [thread:$0]  %s1943_s1, 2048, %s35_s28, [#allocation6], %s1757_s15, %s1757_s15, %s1758_s16  }
  0x14   :  { %s1759_s19 = smov [#allocation8]   ;;  %s1760_s21 = smov [#allocation2]  }
  0x15   :  { %s58_s20 = sshll.u32 %s1759_s19, 4  ;;  %s22_s22 = sshll.u32 %s1760_s21, 4  ;;  %s59_s20 = int_to_ptr.vmem [resolvable:$true] %s58_s20  ;;  %s23_s22 = int_to_ptr.vmem [resolvable:$true] %s22_s22 }
  0x16   :  { %s1638_s25 = scalar_lea.hbm %s1945_s3, 1024 }
  0x17   :  { %p1639_p8 = scmp.ne.s32.totalorder %s1945_s3, %s1638_s25  ;;  %p1642_p9 = scmp.lt.u32.totalorder %s1638_s25, %s1945_s3 }
  0x19   :  { %p1644_p10 = pnand %p1642_p9, %p1639_p8 }
  0x1b   :  { %1647 = shalt.err (!%p1644_p10)
}
  0x1c   :  { %s1648_s1 = scalar_lea.vmem %s59_s20, 1024  ;;  %p1653_p12 = scmp.lt.s32.totalorder %s59_s20, %s59_s20 }
  0x1d   :  { %p1649_p11 = scmp.ne.s32.totalorder %s59_s20, %s1648_s1  ;;  %p1654_p13 = scmp.lt.s32.totalorder %s1648_s1, %s1648_s1 }
  0x1f   :  { %p1655_p0 = por %p1654_p13, %p1653_p12 }
  0x21   :  { %p1656_p1 = pnand %p1655_p0, %p1649_p11 }
  0x23   :  { %1659 = shalt.err (!%p1656_p1)
}
  0x24   :  { %s1761_s28 = smov 64   ;;  %s1762_s9 = smov 4  }
  0x25   :  { %64 = dma.hbm_to_vmem [thread:$0]  %s1945_s3, 1024, %s59_s20, [#allocation9], %s1761_s28, %s1761_s28, %s1762_s9  }
  0x26   :  { %s1660_s14 = scalar_lea.hbm %s1942_s0, 1024 }
  0x27   :  { %p1661_p2 = scmp.ne.s32.totalorder %s1942_s0, %s1660_s14  ;;  %p1664_p3 = scmp.lt.u32.totalorder %s1660_s14, %s1942_s0 }
  0x29   :  { %p1666_p4 = pnand %p1664_p3, %p1661_p2 }
  0x2b   :  { %1669 = shalt.err (!%p1666_p4)
}
  0x2c   :  { %s1670_s19 = scalar_lea.vmem %s23_s22, 1024  ;;  %p1675_p6 = scmp.lt.s32.totalorder %s23_s22, %s23_s22 }
  0x2d   :  { %p1671_p5 = scmp.ne.s32.totalorder %s23_s22, %s1670_s19  ;;  %p1676_p7 = scmp.lt.s32.totalorder %s1670_s19, %s1670_s19 }
  0x2f   :  { %p1677_p8 = por %p1676_p7, %p1675_p6 }
  0x31   :  { %p1678_p9 = pnand %p1677_p8, %p1671_p5 }
  0x33   :  { %1681 = shalt.err (!%p1678_p9)
}
  0x34   :  { %28 = dma.hbm_to_vmem [thread:$0]  %s1942_s0, 1024, %s23_s22, [#allocation3], %s1761_s28, %s1761_s28, %s1762_s9  }
  0x35   :  { %s1763_s21 = smov [#allocation7]   ;;  %s1764_s24 = smov [#allocation10]  }
  0x36   :  { %s46_s23 = sshll.u32 %s1763_s21, 4  ;;  %s70_s25 = sshll.u32 %s1764_s24, 4  ;;  %s47_s23 = int_to_ptr.vmem [resolvable:$true] %s46_s23  ;;  %s71_s25 = int_to_ptr.vmem [resolvable:$true] %s70_s25 }
  0x37   :  { %s1682_s29 = scalar_lea.hbm %s1944_s2, 1024 }
  0x38   :  { %p1683_p10 = scmp.ne.s32.totalorder %s1944_s2, %s1682_s29  ;;  %p1686_p11 = scmp.lt.u32.totalorder %s1682_s29, %s1944_s2 }
  0x3a   :  { %p1688_p12 = pnand %p1686_p11, %p1683_p10 }
  0x3c   :  { %1691 = shalt.err (!%p1688_p12)
}
  0x3d   :  { %s1692_s0 = scalar_lea.vmem %s47_s23, 1024  ;;  %p1697_p0 = scmp.lt.s32.totalorder %s47_s23, %s47_s23 }
  0x3e   :  { %p1693_p13 = scmp.ne.s32.totalorder %s47_s23, %s1692_s0  ;;  %p1698_p1 = scmp.lt.s32.totalorder %s1692_s0, %s1692_s0 }
  0x40   :  { %p1699_p2 = por %p1698_p1, %p1697_p0 }
  0x42   :  { %p1700_p3 = pnand %p1699_p2, %p1693_p13 }
  0x44   :  { %1703 = shalt.err (!%p1700_p3)
}
  0x45   :  { %52 = dma.hbm_to_vmem [thread:$0]  %s1944_s2, 1024, %s47_s23, [#allocation6], %s1761_s28, %s1761_s28, %s1762_s9  }
  0x46   :  { %s1704_s15 = scalar_lea.hbm %s1946_s4, 1024 }
  0x47   :  { %p1705_p4 = scmp.ne.s32.totalorder %s1946_s4, %s1704_s15  ;;  %p1708_p5 = scmp.lt.u32.totalorder %s1704_s15, %s1946_s4 }
  0x49   :  { %p1710_p6 = pnand %p1708_p5, %p1705_p4 }
  0x4b   :  { %1713 = shalt.err (!%p1710_p6)
}
  0x4c   :  { %s1714_s3 = scalar_lea.vmem %s71_s25, 1024  ;;  %p1719_p8 = scmp.lt.s32.totalorder %s71_s25, %s71_s25 }
  0x4d   :  { %p1715_p7 = scmp.ne.s32.totalorder %s71_s25, %s1714_s3  ;;  %p1720_p9 = scmp.lt.s32.totalorder %s1714_s3, %s1714_s3 }
  0x4f   :  { %p1721_p10 = por %p1720_p9, %p1719_p8 }
  0x51   :  { %p1722_p11 = pnand %p1721_p10, %p1715_p7 }
  0x53   :  { %1725 = shalt.err (!%p1722_p11)
}
  0x54   :  { %76 = dma.hbm_to_vmem [thread:$0]  %s1946_s4, 1024, %s71_s25, [#allocation9], %s1761_s28, %s1761_s28, %s1762_s9  }
  0x55   :  { %1748 = dma.done.wait [#allocation3], 1024  }
  0x56   :  { %1749 = vsyncadd [#allocation3], 4294966272 }
  0x57   :  { %1750 = dma.done.wait [#allocation6], 3072  }
  0x58   :  { %1751 = vsyncadd [#allocation6], 4294964224 }
  0x59   :  { %1752 = dma.done.wait [#allocation9], 2048  }
  0x5a   :  { %1753 = vsyncadd [#allocation9], 4294965248  ;;  %v99_v0 = vld [vmem:[#allocation5] sm:$0xff]  ;;  %v100_v1 = vld [vmem:[#allocation5 + $0x8] sm:$0xff] }
  0x5b   :  { %v101_v2 = vld [vmem:[#allocation5 + $0x10] sm:$0xff]  ;;  %v148_v3 = vpack.c.bf16 %v100_v1, %v99_v0  ;;  %v102_v4 = vld [vmem:[#allocation5 + $0x18] sm:$0xff]  ;;  %v103_v6 = vld [vmem:[#allocation5 + $0x20] sm:$0xff] }
  0x5c   :  { %v149_v5 = vpack.c.bf16 %v102_v4, %v101_v2  ;;  %v104_v7 = vld [vmem:[#allocation5 + $0x28] sm:$0xff]  ;;  %v105_v8 = vld [vmem:[#allocation5 + $0x30] sm:$0xff]  ;;  %v106_v10 = vld [vmem:[#allocation5 + $0x38] sm:$0xff] }
  0x5d   :  { %1364 = vmatprep.subr.bf16.mxu0 %v148_v3  ;;  %v150_v9 = vpack.c.bf16 %v104_v7, %v103_v6  ;;  %v1568_v11 = vld [vmem:[#allocation2] sm:$0xff]   ;;  %v151_v12 = vpack.c.bf16 %v106_v10, %v105_v8  ;;  %v108_v14 = vld [vmem:[#allocation5 + $0x48] sm:$0xff]  ;;  %v109_v15 = vld [vmem:[#allocation5 + $0x50] sm:$0xff] }
  0x5e   :  { %1365 = vmatpush3.bf16.msra.mxu0 %v148_v3  ;;  %1380 = vmatprep.mubr.bf16.mxu0 %v1568_v11  ;;  %v107_v13 = vld [vmem:[#allocation5 + $0x40] sm:$0xff]  ;;  %v110_v17 = vld [vmem:[#allocation5 + $0x58] sm:$0xff]  ;;  %v1577_v19 = vld [vmem:[#allocation7 + $0x8] sm:$0xff]  }
  0x5f   :  { %1366 = vmatprep.subr.bf16.mxu0 %v149_v5  ;;  %v152_v16 = vpack.c.bf16 %v108_v14, %v107_v13  ;;  %v1576_v18 = vld [vmem:[#allocation7] sm:$0xff]   ;;  %v153_v21 = vpack.c.bf16 %v110_v17, %v109_v15  ;;  %v112_v22 = vld [vmem:[#allocation5 + $0x68] sm:$0xff]  ;;  %v1578_v23 = vld [vmem:[#allocation7 + $0x10] sm:$0xff]  }
  0x60   :  { %v111_v20 = vld [vmem:[#allocation5 + $0x60] sm:$0xff]  ;;  %1396 = vmatprep.subr.bf16.mxu1 %v1576_v18  ;;  %v113_v24 = vld [vmem:[#allocation5 + $0x70] sm:$0xff]  ;;  %v114_v25 = vld [vmem:[#allocation5 + $0x78] sm:$0xff] }
  0x61   :  { %1397 = vmatpush3.bf16.msra.mxu1 %v1576_v18  ;;  %v1579_v26 = vld [vmem:[#allocation7 + $0x18] sm:$0xff]   ;;  %v154_v27 = vpack.c.bf16 %v112_v22, %v111_v20  ;;  %v1580_v28 = vld [vmem:[#allocation7 + $0x20] sm:$0xff]   ;;  %v155_v29 = vpack.c.bf16 %v114_v25, %v113_v24  ;;  %v1581_v30 = vld [vmem:[#allocation7 + $0x28] sm:$0xff]  }
  0x62   :  { %1367 = vmatpush3.bf16.msra.mxu0 %v149_v5  ;;  %1398 = vmatprep.subr.bf16.mxu1 %v1577_v19  ;;  %v1569_v31 = vld [vmem:[#allocation2 + $0x8] sm:$0xff]   ;;  %v1570_v32 = vld [vmem:[#allocation2 + $0x10] sm:$0xff]   ;;  %v1571_v34 = vld [vmem:[#allocation2 + $0x18] sm:$0xff]  }
  0x63   :  { %1368 = vmatprep.subr.bf16.mxu0 %v150_v9  ;;  %v1582_v33 = vld [vmem:[#allocation7 + $0x30] sm:$0xff]   ;;  %v1572_v35 = vld [vmem:[#allocation2 + $0x20] sm:$0xff]   ;;  %v1573_v36 = vld [vmem:[#allocation2 + $0x28] sm:$0xff]  }
  0x64   :  { %v1574_v37 = vld [vmem:[#allocation2 + $0x30] sm:$0xff]   ;;  %v1575_v38 = vld [vmem:[#allocation2 + $0x38] sm:$0xff]   ;;  %v1584_v0 = vld [vmem:[#allocation2] sm:$0xff]  }
  0x65   :  { %1399 = vmatpush3.bf16.msra.mxu1 %v1577_v19  ;;  %v1583_v39 = vld [vmem:[#allocation7 + $0x38] sm:$0xff]   ;;  %v1592_v1 = vld [vmem:[#allocation8] sm:$0xff]   ;;  %v1593_v2 = vld [vmem:[#allocation8 + $0x8] sm:$0xff]  }
  0x66   :  { %1369 = vmatpush3.bf16.msra.mxu0 %v150_v9  ;;  %1400 = vmatprep.subr.bf16.mxu1 %v1578_v23  ;;  %v1594_v3 = vld [vmem:[#allocation8 + $0x10] sm:$0xff]   ;;  %v1595_v4 = vld [vmem:[#allocation8 + $0x18] sm:$0xff]   ;;  %v1596_v5 = vld [vmem:[#allocation8 + $0x20] sm:$0xff]  }
  0x67   :  { %1370 = vmatprep.subr.bf16.mxu0 %v151_v12  ;;  %v1597_v6 = vld [vmem:[#allocation8 + $0x28] sm:$0xff]   ;;  %v1598_v7 = vld [vmem:[#allocation8 + $0x30] sm:$0xff]   ;;  %v1888_v8 = vld [vmem:[%s1947_s5] ss:$0 sm:$0xff] }
  0x69   :  { %1401 = vmatpush3.bf16.msra.mxu1 %v1578_v23 }
  0x6a   :  { %1371 = vmatpush3.bf16.msra.mxu0 %v151_v12  ;;  %1402 = vmatprep.subr.bf16.mxu1 %v1579_v26 }
  0x6b   :  { %1372 = vmatprep.subr.bf16.mxu0 %v152_v16 }
  0x6d   :  { %1403 = vmatpush3.bf16.msra.mxu1 %v1579_v26 }
  0x6e   :  { %1373 = vmatpush3.bf16.msra.mxu0 %v152_v16  ;;  %1404 = vmatprep.subr.bf16.mxu1 %v1580_v28 }
  0x6f   :  { %1374 = vmatprep.subr.bf16.mxu0 %v153_v21 }
  0x71   :  { %1405 = vmatpush3.bf16.msra.mxu1 %v1580_v28 }
  0x72   :  { %1375 = vmatpush3.bf16.msra.mxu0 %v153_v21  ;;  %1406 = vmatprep.subr.bf16.mxu1 %v1581_v30 }
  0x73   :  { %1376 = vmatprep.subr.bf16.mxu0 %v154_v27 }
  0x75   :  { %1407 = vmatpush3.bf16.msra.mxu1 %v1581_v30 }
  0x76   :  { %1377 = vmatpush3.bf16.msra.mxu0 %v154_v27  ;;  %1408 = vmatprep.subr.bf16.mxu1 %v1582_v33 }
  0x77   :  { %1378 = vmatprep.subr.bf16.mxu0 %v155_v29 }
  0x79   :  { %1409 = vmatpush3.bf16.msra.mxu1 %v1582_v33 }
  0x7a   :  { %1379 = vmatpush3.bf16.msra.mxu0 %v155_v29  ;;  %1410 = vmatprep.subr.bf16.mxu1 %v1583_v39 }
  0x7d   :  { %1381 = vmatmul.mubr.bf16.vlgmr.msra.gmra.mrb[0].mxu0 %v1569_v31  ;;  %1411 = vmatpush3.bf16.msra.mxu1 %v1583_v39 }
  0x7e   :  { %1384 = vmatprep.mubr.bf16.mxu0 %v1570_v32  ;;  %1460 = vmatprep.subr.bf16.mxu1 %v1592_v1 }
  0x85   :  { %1385 = vmatmul.mubr.bf16.gmra.mrb[4].mxu0 %v1571_v34 }
  0x86   :  { %1388 = vmatprep.mubr.bf16.mxu0 %v1572_v35 }
  0x8d   :  { %1389 = vmatmul.mubr.bf16.gmra.mrb[8].mxu0 %v1573_v36 }
  0x8e   :  { %1392 = vmatprep.mubr.bf16.mxu0 %v1574_v37 }
  0x95   :  { %1393 = vmatmul.mubr.bf16.gmra.mrb[12].mxu0 %v1575_v38 }
  0x96   :  { %1444 = vmatprep.mubr.bf16.mxu0 %v1584_v0 }
 0x150   :  { %v1382_v40 = vpop.f32.mrb[0].mxu0 }
 0x151   :  { %v238_v41 = vpop.f32.mrb[1].mxu0 }
 0x152   :  { %v1383_v42 = vpop.f32.mrb[2].mxu0 }
 0x153   :  { %v302_v43 = vpack.c.bf16 %v1383_v42, %v1382_v40  ;;  %v241_v44 = vpop.f32.mrb[3].mxu0 }
 0x154   :  { %v301_v45 = vpack.c.bf16 %v241_v44, %v238_v41 }
 0x156   :  { %1412 = vmatprep.mubr.bf16.mxu1 %v301_v45 }
 0x157   :  { %1413 = vmatmul.mubr.bf16.vlgmr.msra.gmra.mrb[0].mxu1 %v302_v43 }
 0x158   :  { %v1386_v46 = vpop.f32.mrb[4].mxu0  ;;  %1461 = vmatpush3.bf16.msra.mxu1 %v1592_v1 }
 0x159   :  { %v254_v47 = vpop.f32.mrb[5].mxu0  ;;  %1462 = vmatprep.subr.bf16.mxu1 %v1593_v2 }
 0x15a   :  { %v1387_v48 = vpop.f32.mrb[6].mxu0 }
 0x15b   :  { %v304_v49 = vpack.c.bf16 %v1387_v48, %v1386_v46  ;;  %v257_v50 = vpop.f32.mrb[7].mxu0 }
 0x15c   :  { %v303_v51 = vpack.c.bf16 %v257_v50, %v254_v47  ;;  %1463 = vmatpush3.bf16.msra.mxu1 %v1593_v2  ;;  %v1586_v50 = vld [vmem:[#allocation2 + $0x10] sm:$0xff]  }
 0x15d   :  { %1464 = vmatprep.subr.bf16.mxu1 %v1594_v3 }
 0x15e   :  { %1416 = vmatprep.mubr.bf16.mxu1 %v303_v51  ;;  %v1587_v51 = vld [vmem:[#allocation2 + $0x18] sm:$0xff]  }
 0x15f   :  { %1417 = vmatmul.mubr.bf16.gmra.mrb[4].mxu1 %v304_v49  ;;  %v1585_v49 = vld [vmem:[#allocation2 + $0x8] sm:$0xff]  }
 0x160   :  { %v1390_v52 = vpop.f32.mrb[8].mxu0  ;;  %1465 = vmatpush3.bf16.msra.mxu1 %v1594_v3 }
 0x161   :  { %v270_v53 = vpop.f32.mrb[9].mxu0  ;;  %1466 = vmatprep.subr.bf16.mxu1 %v1595_v4 }
 0x162   :  { %v1391_v54 = vpop.f32.mrb[10].mxu0 }
 0x163   :  { %v306_v55 = vpack.c.bf16 %v1391_v54, %v1390_v52  ;;  %v273_v56 = vpop.f32.mrb[11].mxu0  ;;  %v1588_v52 = vld [vmem:[#allocation2 + $0x20] sm:$0xff]   ;;  %v1590_v54 = vld [vmem:[#allocation2 + $0x30] sm:$0xff]  }
 0x164   :  { %v305_v57 = vpack.c.bf16 %v273_v56, %v270_v53  ;;  %1467 = vmatpush3.bf16.msra.mxu1 %v1595_v4  ;;  %v1589_v53 = vld [vmem:[#allocation2 + $0x28] sm:$0xff]   ;;  %v1599_v56 = vld [vmem:[#allocation8 + $0x38] sm:$0xff]  }
 0x165   :  { %1468 = vmatprep.subr.bf16.mxu1 %v1596_v5 }
 0x166   :  { %1420 = vmatprep.mubr.bf16.mxu1 %v305_v57 }
 0x167   :  { %1421 = vmatmul.mubr.bf16.gmra.mrb[8].mxu1 %v306_v55  ;;  %v1591_v55 = vld [vmem:[#allocation2 + $0x38] sm:$0xff]  }
 0x168   :  { %v1394_v58 = vpop.f32.mrb[12].mxu0  ;;  %1469 = vmatpush3.bf16.msra.mxu1 %v1596_v5 }
 0x169   :  { %v286_v59 = vpop.f32.mrb[13].mxu0  ;;  %1470 = vmatprep.subr.bf16.mxu1 %v1597_v6 }
 0x16a   :  { %v1395_v60 = vpop.f32.mrb[14].mxu0 }
 0x16b   :  { %v308_v61 = vpack.c.bf16 %v1395_v60, %v1394_v58  ;;  %v289_v62 = vpop.f32.mrb[15].mxu0 }
 0x16c   :  { %v307_v63 = vpack.c.bf16 %v289_v62, %v286_v59  ;;  %1471 = vmatpush3.bf16.msra.mxu1 %v1597_v6 }
 0x16d   :  { %1472 = vmatprep.subr.bf16.mxu1 %v1598_v7 }
 0x16e   :  { %1424 = vmatprep.mubr.bf16.mxu1 %v307_v63 }
 0x16f   :  { %1425 = vmatmul.mubr.bf16.gmra.mrb[12].mxu1 %v308_v61 }
 0x170   :  { %1473 = vmatpush3.bf16.msra.mxu1 %v1598_v7 }
 0x171   :  { %1474 = vmatprep.subr.bf16.mxu1 %v1599_v56 }
 0x174   :  { %1475 = vmatpush3.bf16.msra.mxu1 %v1599_v56 }
 0x22a   :  { %v1414_v9 = vpop.f32.mrb[0].mxu1 }
 0x22b   :  { %v406_v10 = vadd.f32 %v1414_v9, %v1888_v8  ;;  %v397_v11 = vpop.f32.mrb[1].mxu1 }
 0x22c   :  { %v398_v12 = vadd.f32 %v1888_v8, %v397_v11  ;;  %v1415_v13 = vpop.f32.mrb[2].mxu1 }
 0x22d   :  { %462 = vst [vmem:[#allocation11 + $0x30] sm:$0xff] %v406_v10  ;;  %v409_v14 = vadd.f32 %v1415_v13, %v1888_v8  ;;  %v400_v15 = vpop.f32.mrb[3].mxu1 }
 0x22e   :  { %460 = vst [vmem:[#allocation11] sm:$0xff] %v398_v12  ;;  %v401_v16 = vadd.f32 %v1888_v8, %v400_v15 }
 0x22f   :  { %463 = vst [vmem:[#allocation11 + $0x48] sm:$0xff] %v409_v14  ;;  %v510_v17 = vpack.c.bf16 %v409_v14, %v406_v10 }
 0x230   :  { %461 = vst [vmem:[#allocation11 + $0x18] sm:$0xff] %v401_v16  ;;  %v509_v18 = vpack.c.bf16 %v401_v16, %v398_v12 }
 0x232   :  { %v1418_v19 = vpop.f32.mrb[4].mxu1  ;;  %1428 = vmatprep.subr.bf16.mxu0 %v509_v18 }
 0x233   :  { %v422_v20 = vadd.f32 %v1418_v19, %v1888_v8  ;;  %v413_v21 = vpop.f32.mrb[5].mxu1  ;;  %1429 = vmatpush3.bf16.msra.mxu0 %v509_v18  ;;  %v1608_v18 = vld [vmem:[#allocation10] sm:$0xff]   ;;  %v1609_v19 = vld [vmem:[#allocation10 + $0x8] sm:$0xff]  }
 0x234   :  { %v414_v22 = vadd.f32 %v1888_v8, %v413_v21  ;;  %v1419_v23 = vpop.f32.mrb[6].mxu1  ;;  %1430 = vmatprep.subr.bf16.mxu0 %v510_v17  ;;  %1524 = vmatprep.subr.bf16.mxu1 %v1608_v18  ;;  %v1611_v21 = vld [vmem:[#allocation10 + $0x18] sm:$0xff]  }
 0x235   :  { %466 = vst [vmem:[#allocation11 + $0x90] sm:$0xff] %v422_v20  ;;  %v425_v24 = vadd.f32 %v1419_v23, %v1888_v8  ;;  %v416_v25 = vpop.f32.mrb[7].mxu1  ;;  %v1613_v23 = vld [vmem:[#allocation10 + $0x28] sm:$0xff]  }
 0x236   :  { %464 = vst [vmem:[#allocation11 + $0x60] sm:$0xff] %v414_v22  ;;  %v417_v26 = vadd.f32 %v1888_v8, %v416_v25  ;;  %v1909_v25 = vld [vmem:[%s1948_s6] ss:$0 sm:$0xff] }
 0x237   :  { %467 = vst [vmem:[#allocation11 + $0xa8] sm:$0xff] %v425_v24  ;;  %v512_v27 = vpack.c.bf16 %v425_v24, %v422_v20  ;;  %1431 = vmatpush3.bf16.msra.mxu0 %v510_v17  ;;  %v1600_v17 = vld [vmem:[#allocation2] sm:$0xff]   ;;  %v1610_v20 = vld [vmem:[#allocation10 + $0x10] sm:$0xff]  }
 0x238   :  { %465 = vst [vmem:[#allocation11 + $0x78] sm:$0xff] %v417_v26  ;;  %v511_v28 = vpack.c.bf16 %v417_v26, %v414_v22  ;;  %v1612_v22 = vld [vmem:[#allocation10 + $0x20] sm:$0xff]   ;;  %v1614_v24 = vld [vmem:[#allocation10 + $0x30] sm:$0xff]  }
 0x23a   :  { %v1422_v29 = vpop.f32.mrb[8].mxu1  ;;  %1432 = vmatprep.subr.bf16.mxu0 %v511_v28 }
 0x23b   :  { %v438_v30 = vadd.f32 %v1422_v29, %v1888_v8  ;;  %v429_v31 = vpop.f32.mrb[9].mxu1  ;;  %1433 = vmatpush3.bf16.msra.mxu0 %v511_v28 }
 0x23c   :  { %v430_v32 = vadd.f32 %v1888_v8, %v429_v31  ;;  %v1423_v33 = vpop.f32.mrb[10].mxu1  ;;  %1434 = vmatprep.subr.bf16.mxu0 %v512_v27 }
 0x23d   :  { %470 = vst [vmem:[#allocation11 + $0xf0] sm:$0xff] %v438_v30  ;;  %v441_v34 = vadd.f32 %v1423_v33, %v1888_v8  ;;  %v432_v35 = vpop.f32.mrb[11].mxu1 }
 0x23e   :  { %468 = vst [vmem:[#allocation11 + $0xc0] sm:$0xff] %v430_v32  ;;  %v433_v36 = vadd.f32 %v1888_v8, %v432_v35 }
 0x23f   :  { %471 = vst [vmem:[#allocation11 + $0x108] sm:$0xff] %v441_v34  ;;  %v514_v37 = vpack.c.bf16 %v441_v34, %v438_v30  ;;  %1435 = vmatpush3.bf16.msra.mxu0 %v512_v27 }
 0x240   :  { %469 = vst [vmem:[#allocation11 + $0xd8] sm:$0xff] %v433_v36  ;;  %v513_v38 = vpack.c.bf16 %v433_v36, %v430_v32 }
 0x242   :  { %v1426_v39 = vpop.f32.mrb[12].mxu1  ;;  %1436 = vmatprep.subr.bf16.mxu0 %v513_v38 }
 0x243   :  { %v454_v40 = vadd.f32 %v1426_v39, %v1888_v8  ;;  %v445_v41 = vpop.f32.mrb[13].mxu1  ;;  %1437 = vmatpush3.bf16.msra.mxu0 %v513_v38 }
 0x244   :  { %v446_v42 = vadd.f32 %v1888_v8, %v445_v41  ;;  %v1427_v43 = vpop.f32.mrb[14].mxu1  ;;  %1438 = vmatprep.subr.bf16.mxu0 %v514_v37 }
 0x245   :  { %474 = vst [vmem:[#allocation11 + $0x150] sm:$0xff] %v454_v40  ;;  %v457_v44 = vadd.f32 %v1427_v43, %v1888_v8  ;;  %v448_v45 = vpop.f32.mrb[15].mxu1 }
 0x246   :  { %472 = vst [vmem:[#allocation11 + $0x120] sm:$0xff] %v446_v42  ;;  %v449_v46 = vadd.f32 %v1888_v8, %v448_v45 }
 0x247   :  { %475 = vst [vmem:[#allocation11 + $0x168] sm:$0xff] %v457_v44  ;;  %v516_v47 = vpack.c.bf16 %v457_v44, %v454_v40  ;;  %1439 = vmatpush3.bf16.msra.mxu0 %v514_v37 }
 0x248   :  { %473 = vst [vmem:[#allocation11 + $0x138] sm:$0xff] %v449_v46  ;;  %v515_v48 = vpack.c.bf16 %v449_v46, %v446_v42 }
 0x24a   :  { %1440 = vmatprep.subr.bf16.mxu0 %v515_v48 }
 0x24b   :  { %1441 = vmatpush3.bf16.msra.mxu0 %v515_v48 }
 0x24c   :  { %1442 = vmatprep.subr.bf16.mxu0 %v516_v47 }
 0x24f   :  { %1443 = vmatpush3.bf16.msra.mxu0 %v516_v47 }
 0x252   :  { %1445 = vmatmul.mubr.bf16.vlgmr.msra.gmra.mrb[16].mxu0 %v1585_v49 }
 0x253   :  { %1448 = vmatprep.mubr.bf16.mxu0 %v1586_v50 }
 0x25a   :  { %1449 = vmatmul.mubr.bf16.gmra.mrb[20].mxu0 %v1587_v51 }
 0x25b   :  { %1452 = vmatprep.mubr.bf16.mxu0 %v1588_v52 }
 0x262   :  { %1453 = vmatmul.mubr.bf16.gmra.mrb[24].mxu0 %v1589_v53 }
 0x263   :  { %1456 = vmatprep.mubr.bf16.mxu0 %v1590_v54 }
 0x26a   :  { %1457 = vmatmul.mubr.bf16.gmra.mrb[28].mxu0 %v1591_v55 }
 0x26b   :  { %1508 = vmatprep.mubr.bf16.mxu0 %v1600_v17 }
 0x325   :  { %v1446_v57 = vpop.f32.mrb[16].mxu0 }
 0x326   :  { %v599_v58 = vpop.f32.mrb[17].mxu0 }
 0x327   :  { %v1447_v59 = vpop.f32.mrb[18].mxu0 }
 0x328   :  { %v663_v60 = vpack.c.bf16 %v1447_v59, %v1446_v57  ;;  %v602_v61 = vpop.f32.mrb[19].mxu0 }
 0x329   :  { %v662_v62 = vpack.c.bf16 %v602_v61, %v599_v58 }
 0x32b   :  { %1476 = vmatprep.mubr.bf16.mxu1 %v662_v62 }
 0x32c   :  { %1477 = vmatmul.mubr.bf16.vlgmr.msra.gmra.mrb[16].mxu1 %v663_v60 }
 0x32d   :  { %v1450_v63 = vpop.f32.mrb[20].mxu0  ;;  %1525 = vmatpush3.bf16.msra.mxu1 %v1608_v18 }
 0x32e   :  { %v615_v0 = vpop.f32.mrb[21].mxu0  ;;  %1526 = vmatprep.subr.bf16.mxu1 %v1609_v19 }
 0x32f   :  { %v1451_v1 = vpop.f32.mrb[22].mxu0 }
 0x330   :  { %v665_v2 = vpack.c.bf16 %v1451_v1, %v1450_v63  ;;  %v618_v3 = vpop.f32.mrb[23].mxu0 }
 0x331   :  { %v664_v4 = vpack.c.bf16 %v618_v3, %v615_v0  ;;  %1527 = vmatpush3.bf16.msra.mxu1 %v1609_v19  ;;  %v1602_v3 = vld [vmem:[#allocation2 + $0x10] sm:$0xff]  }
 0x332   :  { %1528 = vmatprep.subr.bf16.mxu1 %v1610_v20 }
 0x333   :  { %1480 = vmatprep.mubr.bf16.mxu1 %v664_v4  ;;  %v1603_v4 = vld [vmem:[#allocation2 + $0x18] sm:$0xff]  }
 0x334   :  { %1481 = vmatmul.mubr.bf16.gmra.mrb[20].mxu1 %v665_v2  ;;  %v1601_v2 = vld [vmem:[#allocation2 + $0x8] sm:$0xff]  }
 0x335   :  { %v1454_v5 = vpop.f32.mrb[24].mxu0  ;;  %1529 = vmatpush3.bf16.msra.mxu1 %v1610_v20 }
 0x336   :  { %v631_v6 = vpop.f32.mrb[25].mxu0  ;;  %1530 = vmatprep.subr.bf16.mxu1 %v1611_v21 }
 0x337   :  { %v1455_v7 = vpop.f32.mrb[26].mxu0 }
 0x338   :  { %v667_v8 = vpack.c.bf16 %v1455_v7, %v1454_v5  ;;  %v634_v9 = vpop.f32.mrb[27].mxu0  ;;  %v1604_v5 = vld [vmem:[#allocation2 + $0x20] sm:$0xff]   ;;  %v1606_v7 = vld [vmem:[#allocation2 + $0x30] sm:$0xff]  }
 0x339   :  { %v666_v10 = vpack.c.bf16 %v634_v9, %v631_v6  ;;  %1531 = vmatpush3.bf16.msra.mxu1 %v1611_v21  ;;  %v1605_v6 = vld [vmem:[#allocation2 + $0x28] sm:$0xff]   ;;  %v1615_v9 = vld [vmem:[#allocation10 + $0x38] sm:$0xff]  }
 0x33a   :  { %1532 = vmatprep.subr.bf16.mxu1 %v1612_v22 }
 0x33b   :  { %1484 = vmatprep.mubr.bf16.mxu1 %v666_v10 }
 0x33c   :  { %1485 = vmatmul.mubr.bf16.gmra.mrb[24].mxu1 %v667_v8  ;;  %v1607_v8 = vld [vmem:[#allocation2 + $0x38] sm:$0xff]  }
 0x33d   :  { %v1458_v11 = vpop.f32.mrb[28].mxu0  ;;  %1533 = vmatpush3.bf16.msra.mxu1 %v1612_v22 }
 0x33e   :  { %v647_v12 = vpop.f32.mrb[29].mxu0  ;;  %1534 = vmatprep.subr.bf16.mxu1 %v1613_v23 }
 0x33f   :  { %v1459_v13 = vpop.f32.mrb[30].mxu0 }
 0x340   :  { %v669_v14 = vpack.c.bf16 %v1459_v13, %v1458_v11  ;;  %v650_v15 = vpop.f32.mrb[31].mxu0 }
 0x341   :  { %v668_v16 = vpack.c.bf16 %v650_v15, %v647_v12  ;;  %1535 = vmatpush3.bf16.msra.mxu1 %v1613_v23 }
 0x342   :  { %1536 = vmatprep.subr.bf16.mxu1 %v1614_v24 }
 0x343   :  { %1488 = vmatprep.mubr.bf16.mxu1 %v668_v16 }
 0x344   :  { %1489 = vmatmul.mubr.bf16.gmra.mrb[28].mxu1 %v669_v14 }
 0x345   :  { %1537 = vmatpush3.bf16.msra.mxu1 %v1614_v24 }
 0x346   :  { %1538 = vmatprep.subr.bf16.mxu1 %v1615_v9 }
 0x349   :  { %1539 = vmatpush3.bf16.msra.mxu1 %v1615_v9 }
 0x3ff   :  { %v1478_v26 = vpop.f32.mrb[16].mxu1 }
 0x400   :  { %v767_v27 = vadd.f32 %v1478_v26, %v1909_v25  ;;  %v758_v28 = vpop.f32.mrb[17].mxu1 }
 0x401   :  { %v759_v29 = vadd.f32 %v1909_v25, %v758_v28  ;;  %v1479_v30 = vpop.f32.mrb[18].mxu1 }
 0x402   :  { %823 = vst [vmem:[#allocation11 + $0x38] sm:$0xff] %v767_v27  ;;  %v770_v31 = vadd.f32 %v1479_v30, %v1909_v25  ;;  %v761_v32 = vpop.f32.mrb[19].mxu1 }
 0x403   :  { %821 = vst [vmem:[#allocation11 + $0x8] sm:$0xff] %v759_v29  ;;  %v762_v33 = vadd.f32 %v1909_v25, %v761_v32 }
 0x404   :  { %824 = vst [vmem:[#allocation11 + $0x50] sm:$0xff] %v770_v31  ;;  %v871_v34 = vpack.c.bf16 %v770_v31, %v767_v27 }
 0x405   :  { %822 = vst [vmem:[#allocation11 + $0x20] sm:$0xff] %v762_v33  ;;  %v870_v35 = vpack.c.bf16 %v762_v33, %v759_v29 }
 0x407   :  { %v1482_v36 = vpop.f32.mrb[20].mxu1  ;;  %1492 = vmatprep.subr.bf16.mxu0 %v870_v35 }
 0x408   :  { %v783_v37 = vadd.f32 %v1482_v36, %v1909_v25  ;;  %v774_v38 = vpop.f32.mrb[21].mxu1  ;;  %1493 = vmatpush3.bf16.msra.mxu0 %v870_v35 }
 0x409   :  { %v775_v39 = vadd.f32 %v1909_v25, %v774_v38  ;;  %v1483_v40 = vpop.f32.mrb[22].mxu1  ;;  %1494 = vmatprep.subr.bf16.mxu0 %v871_v34 }
 0x40a   :  { %827 = vst [vmem:[#allocation11 + $0x98] sm:$0xff] %v783_v37  ;;  %v786_v41 = vadd.f32 %v1483_v40, %v1909_v25  ;;  %v777_v42 = vpop.f32.mrb[23].mxu1 }
 0x40b   :  { %825 = vst [vmem:[#allocation11 + $0x68] sm:$0xff] %v775_v39  ;;  %v778_v43 = vadd.f32 %v1909_v25, %v777_v42 }
 0x40c   :  { %828 = vst [vmem:[#allocation11 + $0xb0] sm:$0xff] %v786_v41  ;;  %v873_v44 = vpack.c.bf16 %v786_v41, %v783_v37  ;;  %1495 = vmatpush3.bf16.msra.mxu0 %v871_v34  ;;  %v1259_v34 = vld [vmem:[%s1949_s7] ss:$0 sm:$0xff]  ;;  %s1765_s7 = smov [#allocation11]  }
 0x40d   :  { %826 = vst [vmem:[#allocation11 + $0x80] sm:$0xff] %v778_v43  ;;  %v872_v45 = vpack.c.bf16 %v778_v43, %v775_v39  ;;  %s1203_s23 = sshll.u32 %s1765_s7, 4  ;;  %s1204_s23 = int_to_ptr.vmem [resolvable:$true] %s1203_s23 }
 0x40e   :  { %s1726_s24 = scalar_lea.vmem %s1204_s23, 6144  ;;  %p1731_p13 = scmp.lt.s32.totalorder %s1204_s23, %s1204_s23 }
 0x40f   :  { %v1486_v46 = vpop.f32.mrb[24].mxu1  ;;  %1496 = vmatprep.subr.bf16.mxu0 %v872_v45  ;;  %p1727_p12 = scmp.ne.s32.totalorder %s1204_s23, %s1726_s24  ;;  %p1732_p0 = scmp.lt.s32.totalorder %s1726_s24, %s1726_s24 }
 0x410   :  { %v799_v47 = vadd.f32 %v1486_v46, %v1909_v25  ;;  %v790_v48 = vpop.f32.mrb[25].mxu1  ;;  %1497 = vmatpush3.bf16.msra.mxu0 %v872_v45 }
 0x411   :  { %v791_v49 = vadd.f32 %v1909_v25, %v790_v48  ;;  %v1487_v50 = vpop.f32.mrb[26].mxu1  ;;  %1498 = vmatprep.subr.bf16.mxu0 %v873_v44  ;;  %p1733_p1 = por %p1732_p0, %p1731_p13 }
 0x412   :  { %831 = vst [vmem:[#allocation11 + $0xf8] sm:$0xff] %v799_v47  ;;  %v802_v51 = vadd.f32 %v1487_v50, %v1909_v25  ;;  %v793_v52 = vpop.f32.mrb[27].mxu1 }
 0x413   :  { %829 = vst [vmem:[#allocation11 + $0xc8] sm:$0xff] %v791_v49  ;;  %v794_v53 = vadd.f32 %v1909_v25, %v793_v52  ;;  %p1734_p2 = pnand %p1733_p1, %p1727_p12 }
 0x414   :  { %832 = vst [vmem:[#allocation11 + $0x110] sm:$0xff] %v802_v51  ;;  %v875_v54 = vpack.c.bf16 %v802_v51, %v799_v47  ;;  %1499 = vmatpush3.bf16.msra.mxu0 %v873_v44 }
 0x415   :  { %830 = vst [vmem:[#allocation11 + $0xe0] sm:$0xff] %v794_v53  ;;  %v874_v55 = vpack.c.bf16 %v794_v53, %v791_v49 }
 0x417   :  { %v1490_v56 = vpop.f32.mrb[28].mxu1  ;;  %1500 = vmatprep.subr.bf16.mxu0 %v874_v55 }
 0x418   :  { %v815_v57 = vadd.f32 %v1490_v56, %v1909_v25  ;;  %v806_v58 = vpop.f32.mrb[29].mxu1  ;;  %1501 = vmatpush3.bf16.msra.mxu0 %v874_v55 }
 0x419   :  { %v807_v59 = vadd.f32 %v1909_v25, %v806_v58  ;;  %v1491_v60 = vpop.f32.mrb[30].mxu1  ;;  %1502 = vmatprep.subr.bf16.mxu0 %v875_v54 }
 0x41a   :  { %835 = vst [vmem:[#allocation11 + $0x158] sm:$0xff] %v815_v57  ;;  %v818_v61 = vadd.f32 %v1491_v60, %v1909_v25  ;;  %v809_v62 = vpop.f32.mrb[31].mxu1 }
 0x41b   :  { %833 = vst [vmem:[#allocation11 + $0x128] sm:$0xff] %v807_v59  ;;  %v810_v63 = vadd.f32 %v1909_v25, %v809_v62 }
 0x41c   :  { %836 = vst [vmem:[#allocation11 + $0x170] sm:$0xff] %v818_v61  ;;  %v877_v0 = vpack.c.bf16 %v818_v61, %v815_v57  ;;  %1503 = vmatpush3.bf16.msra.mxu0 %v875_v54 }
 0x41d   :  { %834 = vst [vmem:[#allocation11 + $0x140] sm:$0xff] %v810_v63  ;;  %v876_v1 = vpack.c.bf16 %v810_v63, %v807_v59 }
 0x41f   :  { %1504 = vmatprep.subr.bf16.mxu0 %v876_v1 }
 0x420   :  { %1505 = vmatpush3.bf16.msra.mxu0 %v876_v1 }
 0x421   :  { %1506 = vmatprep.subr.bf16.mxu0 %v877_v0 }
 0x424   :  { %1507 = vmatpush3.bf16.msra.mxu0 %v877_v0 }
 0x427   :  { %1509 = vmatmul.mubr.bf16.vlgmr.msra.gmra.mrb[32].mxu0 %v1601_v2 }
 0x428   :  { %1512 = vmatprep.mubr.bf16.mxu0 %v1602_v3 }
 0x42f   :  { %1513 = vmatmul.mubr.bf16.gmra.mrb[36].mxu0 %v1603_v4 }
 0x430   :  { %1516 = vmatprep.mubr.bf16.mxu0 %v1604_v5 }
 0x437   :  { %1517 = vmatmul.mubr.bf16.gmra.mrb[40].mxu0 %v1605_v6 }
 0x438   :  { %1520 = vmatprep.mubr.bf16.mxu0 %v1606_v7 }
 0x43f   :  { %1521 = vmatmul.mubr.bf16.gmra.mrb[44].mxu0 %v1607_v8 }
 0x4fa   :  { %v1510_v10 = vpop.f32.mrb[32].mxu0 }
 0x4fb   :  { %v960_v11 = vpop.f32.mrb[33].mxu0 }
 0x4fc   :  { %v1511_v12 = vpop.f32.mrb[34].mxu0 }
 0x4fd   :  { %v1024_v13 = vpack.c.bf16 %v1511_v12, %v1510_v10  ;;  %v963_v14 = vpop.f32.mrb[35].mxu0 }
 0x4fe   :  { %v1023_v15 = vpack.c.bf16 %v963_v14, %v960_v11 }
 0x500   :  { %1540 = vmatprep.mubr.bf16.mxu1 %v1023_v15 }
 0x501   :  { %1541 = vmatmul.mubr.bf16.vlgmr.msra.gmra.mrb[32].mxu1 %v1024_v13 }
 0x502   :  { %v1514_v16 = vpop.f32.mrb[36].mxu0 }
 0x503   :  { %v976_v17 = vpop.f32.mrb[37].mxu0 }
 0x504   :  { %v1515_v18 = vpop.f32.mrb[38].mxu0 }
 0x505   :  { %v1026_v19 = vpack.c.bf16 %v1515_v18, %v1514_v16  ;;  %v979_v20 = vpop.f32.mrb[39].mxu0 }
 0x506   :  { %v1025_v21 = vpack.c.bf16 %v979_v20, %v976_v17 }
 0x508   :  { %1544 = vmatprep.mubr.bf16.mxu1 %v1025_v21 }
 0x509   :  { %1545 = vmatmul.mubr.bf16.gmra.mrb[36].mxu1 %v1026_v19 }
 0x50a   :  { %v1518_v22 = vpop.f32.mrb[40].mxu0 }
 0x50b   :  { %v992_v23 = vpop.f32.mrb[41].mxu0 }
 0x50c   :  { %v1519_v24 = vpop.f32.mrb[42].mxu0 }
 0x50d   :  { %v1028_v25 = vpack.c.bf16 %v1519_v24, %v1518_v22  ;;  %v995_v26 = vpop.f32.mrb[43].mxu0 }
 0x50e   :  { %v1027_v27 = vpack.c.bf16 %v995_v26, %v992_v23 }
 0x510   :  { %1548 = vmatprep.mubr.bf16.mxu1 %v1027_v27 }
 0x511   :  { %1549 = vmatmul.mubr.bf16.gmra.mrb[40].mxu1 %v1028_v25 }
 0x512   :  { %v1522_v28 = vpop.f32.mrb[44].mxu0 }
 0x513   :  { %v1008_v29 = vpop.f32.mrb[45].mxu0 }
 0x514   :  { %v1523_v30 = vpop.f32.mrb[46].mxu0 }
 0x515   :  { %v1030_v31 = vpack.c.bf16 %v1523_v30, %v1522_v28  ;;  %v1011_v32 = vpop.f32.mrb[47].mxu0 }
 0x516   :  { %v1029_v33 = vpack.c.bf16 %v1011_v32, %v1008_v29 }
 0x518   :  { %1552 = vmatprep.mubr.bf16.mxu1 %v1029_v33 }
 0x519   :  { %1553 = vmatmul.mubr.bf16.gmra.mrb[44].mxu1 %v1030_v31 }
 0x5d4   :  { %v1542_v35 = vpop.f32.mrb[32].mxu1 }
 0x5d5   :  { %v1128_v36 = vadd.f32 %v1542_v35, %v1259_v34  ;;  %v1119_v37 = vpop.f32.mrb[33].mxu1 }
 0x5d6   :  { %v1120_v38 = vadd.f32 %v1259_v34, %v1119_v37  ;;  %v1543_v39 = vpop.f32.mrb[34].mxu1 }
 0x5d7   :  { %1184 = vst [vmem:[#allocation11 + $0x40] sm:$0xff] %v1128_v36  ;;  %v1131_v40 = vadd.f32 %v1543_v39, %v1259_v34  ;;  %v1122_v41 = vpop.f32.mrb[35].mxu1 }
 0x5d8   :  { %1182 = vst [vmem:[#allocation11 + $0x10] sm:$0xff] %v1120_v38  ;;  %v1123_v42 = vadd.f32 %v1259_v34, %v1122_v41 }
 0x5d9   :  { %1185 = vst [vmem:[#allocation11 + $0x58] sm:$0xff] %v1131_v40 }
 0x5da   :  { %1183 = vst [vmem:[#allocation11 + $0x28] sm:$0xff] %v1123_v42 }
 0x5dc   :  { %v1546_v43 = vpop.f32.mrb[36].mxu1 }
 0x5dd   :  { %v1144_v44 = vadd.f32 %v1546_v43, %v1259_v34  ;;  %v1135_v45 = vpop.f32.mrb[37].mxu1 }
 0x5de   :  { %v1136_v46 = vadd.f32 %v1259_v34, %v1135_v45  ;;  %v1547_v47 = vpop.f32.mrb[38].mxu1 }
 0x5df   :  { %1188 = vst [vmem:[#allocation11 + $0xa0] sm:$0xff] %v1144_v44  ;;  %v1147_v48 = vadd.f32 %v1547_v47, %v1259_v34  ;;  %v1138_v49 = vpop.f32.mrb[39].mxu1 }
 0x5e0   :  { %1186 = vst [vmem:[#allocation11 + $0x70] sm:$0xff] %v1136_v46  ;;  %v1139_v50 = vadd.f32 %v1259_v34, %v1138_v49 }
 0x5e1   :  { %1189 = vst [vmem:[#allocation11 + $0xb8] sm:$0xff] %v1147_v48 }
 0x5e2   :  { %1187 = vst [vmem:[#allocation11 + $0x88] sm:$0xff] %v1139_v50 }
 0x5e4   :  { %v1550_v51 = vpop.f32.mrb[40].mxu1 }
 0x5e5   :  { %v1160_v52 = vadd.f32 %v1550_v51, %v1259_v34  ;;  %v1151_v53 = vpop.f32.mrb[41].mxu1 }
 0x5e6   :  { %v1152_v54 = vadd.f32 %v1259_v34, %v1151_v53  ;;  %v1551_v55 = vpop.f32.mrb[42].mxu1 }
 0x5e7   :  { %1192 = vst [vmem:[#allocation11 + $0x100] sm:$0xff] %v1160_v52  ;;  %v1163_v56 = vadd.f32 %v1551_v55, %v1259_v34  ;;  %v1154_v57 = vpop.f32.mrb[43].mxu1 }
 0x5e8   :  { %1190 = vst [vmem:[#allocation11 + $0xd0] sm:$0xff] %v1152_v54  ;;  %v1155_v58 = vadd.f32 %v1259_v34, %v1154_v57 }
 0x5e9   :  { %1193 = vst [vmem:[#allocation11 + $0x118] sm:$0xff] %v1163_v56 }
 0x5ea   :  { %1191 = vst [vmem:[#allocation11 + $0xe8] sm:$0xff] %v1155_v58 }
 0x5ec   :  { %v1554_v59 = vpop.f32.mrb[44].mxu1 }
 0x5ed   :  { %v1176_v60 = vadd.f32 %v1554_v59, %v1259_v34  ;;  %v1167_v61 = vpop.f32.mrb[45].mxu1 }
 0x5ee   :  { %v1168_v62 = vadd.f32 %v1259_v34, %v1167_v61  ;;  %v1555_v63 = vpop.f32.mrb[46].mxu1 }
 0x5ef   :  { %1196 = vst [vmem:[#allocation11 + $0x160] sm:$0xff] %v1176_v60  ;;  %v1179_v0 = vadd.f32 %v1555_v63, %v1259_v34  ;;  %v1170_v1 = vpop.f32.mrb[47].mxu1 }
 0x5f0   :  { %1194 = vst [vmem:[#allocation11 + $0x130] sm:$0xff] %v1168_v62  ;;  %v1171_v2 = vadd.f32 %v1259_v34, %v1170_v1 }
 0x5f1   :  { %1197 = vst [vmem:[#allocation11 + $0x178] sm:$0xff] %v1179_v0 }
 0x5f2   :  { %1195 = vst [vmem:[#allocation11 + $0x148] sm:$0xff] %v1171_v2 }
 0x5f3   :  { %1737 = shalt.err (!%p1734_p2)
}
 0x5f4   :  { %s1738_s27 = scalar_lea.hbm %s1950_s8, 6144 }
 0x5f5   :  { %p1739_p3 = scmp.ne.s32.totalorder %s1950_s8, %s1738_s27  ;;  %p1742_p4 = scmp.lt.u32.totalorder %s1738_s27, %s1950_s8 }
 0x5f7   :  { %p1744_p5 = pnand %p1742_p4, %p1739_p3 }
 0x5f9   :  { %1747 = shalt.err (!%p1744_p5)
}
 0x5fa   :  { %s1766_s11 = smov 384   ;;  %s1767_s0 = smov 24  }
 0x5fb   :  { %1209 = dma.vmem_to_hbm [thread:$0]  %s1204_s23, 6144, %s1950_s8, [#allocation4], %s1766_s11, %s1766_s11, %s1767_s0  }
 0x5fc   :  { %1754 = dma.done.wait [#allocation4], 6144  }
 0x5fd   :  { %1755 = vsyncadd [#allocation4], 4294961152 }
 0x5fe   :  { %1213 = vsyncpa [#allocation3], 1 }
 0x5ff   :  { %1214 = vsyncpa [#allocation6], 1 }
 0x600   :  { %1215 = vsyncpa [#allocation9], 1 }
 0x601   :  { %1216 = vsyncpa [#allocation4], 1 }

</bundles_post_ra>
